<compile_context>
chip_gen: v7x
topology: tpu7x:2x2x1
jax: 0.10.0
libtpu: 0.0.40
codegen_flags: <defaults>
</compile_context>

<pallas_src>
import jax
import jax.numpy as jnp
from jax.experimental import pallas as pl
from jax.experimental.pallas import tpu as pltpu


def _edge_mlp_kernel(row_ref, col_ref, t_ref, b1_ref, w2t_ref, b2_ref,
                     w3t_ref, b3_ref, w4_ref, b4_ref, o_ref):
    tm = row_ref.shape[1]
    two_n = t_ref.shape[1]
    n_nodes = two_n // 2

    # Combined one-hot (2N, TM), built directly in bf16:
    #   top half selects (z @ W1[:H])[row], bottom half (z @ W1[H:])[col].
    node_ids = jax.lax.broadcasted_iota(jnp.int32, (two_n, tm), 0)
    sel = (node_ids == row_ref[...]) | (node_ids == (col_ref[...] + n_nodes))
    oh = sel.astype(jnp.bfloat16)

    # Fused gather + lin1 + relu:  (H, 2N) @ (2N, TM) -> (H, TM)
    h = jnp.dot(t_ref[...], oh, preferred_element_type=jnp.float32) + b1_ref[...]
    h = jnp.maximum(h, 0.0)

    # lin2 + relu (transposed: W2^T @ h), bf16 MXU, f32 accumulate.
    h = jnp.dot(w2t_ref[...], h.astype(jnp.bfloat16),
                preferred_element_type=jnp.float32) + b2_ref[...]
    h = jnp.maximum(h, 0.0)

    # lin3 + relu.
    h = jnp.dot(w3t_ref[...], h.astype(jnp.bfloat16),
                preferred_element_type=jnp.float32) + b3_ref[...]
    h = jnp.maximum(h, 0.0)

    # lin4 (out_features = 1): VPU multiply + sublane reduce, lane-dense store.
    o_ref[...] = jnp.sum(h * w4_ref[...], axis=0, keepdims=True) + b4_ref[...]


def init_edge_decoder_params(key, hidden_channels):
    """Deterministic synthetic init. Matmul weights stored (in, out) in bf16;
    biases and the final row-vector weight in f32."""
    ks = jax.random.split(key, 8)
    H = hidden_channels

    def w(k, fan_in, fan_out, dtype):
        return (jax.random.normal(k, (fan_in, fan_out), jnp.float32)
                / jnp.sqrt(jnp.float32(fan_in))).astype(dtype)

    return {
        "w1": w(ks[0], 2 * H, H, jnp.bfloat16),
        "b1": jax.random.normal(ks[1], (1, H), jnp.float32) * 0.01,
        "w2": w(ks[2], H, H, jnp.bfloat16),
        "b2": jax.random.normal(ks[3], (1, H), jnp.float32) * 0.01,
        "w3": w(ks[4], H, H, jnp.bfloat16),
        "b3": jax.random.normal(ks[5], (1, H), jnp.float32) * 0.01,
        "w4": (jax.random.normal(ks[6], (1, H), jnp.float32)
               / jnp.sqrt(jnp.float32(H))),
        "b4": jax.random.normal(ks[7], (1, 1), jnp.float32) * 0.01,
    }


def edge_decoder_forward(z_author, edge_label_index, params, *, tile_m=512):
    """Equivalent of EdgeDecoder.forward(z_dict, edge_label_index)."""
    H = params["w2"].shape[0]
    N = z_author.shape[0]
    E = edge_label_index.shape[1]

    # Lane-dense edge tiling (blocks of width tile_m, a multiple of 128);
    # don't over-pad when E is small.
    tile_m = int(max(128, min(tile_m, pl.cdiv(E, 128) * 128)))
    n_tiles = pl.cdiv(E, tile_m)
    e_pad = n_tiles * tile_m
    pad = e_pad - E

    # Only int32 indices stream through the grid; pad with node 0 (sliced off).
    # Note: out-of-range indices map to an all-zero gather instead of erroring.
    row = jnp.pad(edge_label_index[0].astype(jnp.int32),
                  (0, pad)).reshape(n_tiles, tile_m)
    col = jnp.pad(edge_label_index[1].astype(jnp.int32),
                  (0, pad)).reshape(n_tiles, tile_m)

    # Fold lin1 into the gather table:
    #   cat([z[r], z[c]]) @ W1 == (z @ W1[:H])[r] + (z @ W1[H:])[c]
    z_bf = z_author.astype(jnp.bfloat16)
    t_tab = jnp.concatenate(
        [jnp.dot(z_bf, params["w1"][:H], preferred_element_type=jnp.float32),
         jnp.dot(z_bf, params["w1"][H:], preferred_element_type=jnp.float32)],
        axis=0).astype(jnp.bfloat16)              # (2N, H)
    t_t = t_tab.T                                  # (H, 2N) bf16, VMEM-resident

    # Transposed weight/bias layout so activations are (H, TM).
    w2t = params["w2"].T                           # (H, H) bf16
    w3t = params["w3"].T                           # (H, H) bf16
    b1c = params["b1"].reshape(H, 1)
    b2c = params["b2"].reshape(H, 1)
    b3c = params["b3"].reshape(H, 1)
    w4c = params["w4"].reshape(H, 1)
    b4 = params["b4"].reshape(1, 1)

    # VMEM footprint estimate: resident table + weights (single-buffered),
    # streamed index/output tiles (double-buffered, sublane-padded), and the
    # (2N, TM) one-hot + (H, TM) activation temporaries.
    resident_bytes = (H * 2 * N * 2) + 2 * H * H * 2 + 5 * H * 128 * 4
    stream_bytes = 3 * 2 * 8 * tile_m * 4
    temp_bytes = 2 * N * tile_m * 2 + 4 * H * tile_m * 4
    est = resident_bytes + stream_bytes + temp_bytes
    # Cap at 48 MiB (v7x has 64 MiB/TC); v5e/v6e (128 MiB) could raise this
    # for very large node tables.
    vmem_limit = int(min(48 * 2 ** 20, max(32 * 2 ** 20, 2 * est)))

    edge_spec = pl.BlockSpec((1, tile_m), lambda i: (i, 0))
    out_spec = pl.BlockSpec((1, tile_m), lambda i: (i, 0))

    def build_call(single_buffer_resident):
        if single_buffer_resident:
            resident = lambda shape: pl.BlockSpec(
                shape, lambda i: (0, 0), pipeline_mode=pl.Buffered(1))
        else:
            resident = lambda shape: pl.BlockSpec(shape, lambda i: (0, 0))
        return pl.pallas_call(
            _edge_mlp_kernel,
            out_shape=jax.ShapeDtypeStruct((n_tiles, tile_m), jnp.float32),
            grid=(n_tiles,),
            in_specs=[
                edge_spec, edge_spec,                  # row, col indices
                resident((H, 2 * N)),                  # fused gather+lin1 table
                resident((H, 1)),                      # b1
                resident((H, H)), resident((H, 1)),    # lin2
                resident((H, H)), resident((H, 1)),    # lin3
                resident((H, 1)), resident((1, 1)),    # lin4
            ],
            out_specs=out_spec,
            compiler_params=pltpu.CompilerParams(
                dimension_semantics=("parallel",),     # dual-TC sharding on v7x
                vmem_limit_bytes=vmem_limit),
        )

    args = (row, col, t_t, b1c, w2t, b2c, w3t, b3c, w4c, b4)
    try:
        out = build_call(True)(*args)
    except Exception:
        # Fallback for jax versions without BlockSpec(pipeline_mode=...):
        # identical semantics, default double-buffered resident blocks.
        out = build_call(False)(*args)

    return out.reshape(-1)[:E]          # z.view(-1)


def edge_decoder_reference_bf16(z_author, edge_label_index, params):
    """Pure-JAX reference mirroring the kernel's bf16 layer boundaries
    (bf16 weights / activations into each matmul, f32 accumulation)."""
    row, col = edge_label_index[0], edge_label_index[1]
    H = params["w2"].shape[0]
    N = z_author.shape[0]
    z_bf = z_author.astype(jnp.bfloat16)
    t = jnp.concatenate(
        [jnp.dot(z_bf, params["w1"][:H], preferred_element_type=jnp.float32),
         jnp.dot(z_bf, params["w1"][H:], preferred_element_type=jnp.float32)],
        axis=0).astype(jnp.bfloat16)                       # (2N, H)
    h = (t[row].astype(jnp.float32) + t[N + col].astype(jnp.float32)
         + params["b1"])
    h = jax.nn.relu(h)
    h = jax.nn.relu(jnp.dot(h.astype(jnp.bfloat16), params["w2"],
                            preferred_element_type=jnp.float32) + params["b2"])
    h = jax.nn.relu(jnp.dot(h.astype(jnp.bfloat16), params["w3"],
                            preferred_element_type=jnp.float32) + params["b3"])
    return jnp.sum(h * params["w4"], axis=-1) + params["b4"][0, 0]


def edge_decoder_reference_f32(z_author, edge_label_index, params):
    """Straightforward full-f32 mirror of the PyTorch forward."""
    row, col = edge_label_index[0], edge_label_index[1]
    w1 = params["w1"].astype(jnp.float32)
    w2 = params["w2"].astype(jnp.float32)
    w3 = params["w3"].astype(jnp.float32)
    z = jnp.concatenate([z_author[row], z_author[col]], axis=-1)
    h = jax.nn.relu(z @ w1 + params["b1"])
    h = jax.nn.relu(h @ w2 + params["b2"])
    h = jax.nn.relu(h @ w3 + params["b3"])
    return (h @ params["w4"].T + params["b4"]).reshape(-1)


if __name__ == "__main__":
    key = jax.random.PRNGKey(0)
    k_z, k_e, k_p = jax.random.split(key, 3)

    hidden_channels = 32
    num_nodes = 16
    num_edges = 8

    z_author = jax.random.normal(k_z, (num_nodes, hidden_channels), jnp.float32)
    edge_label_index = jax.random.randint(
        k_e, (2, num_edges), 0, num_nodes, dtype=jnp.int32)
    params = init_edge_decoder_params(k_p, hidden_channels)

    out = edge_decoder_forward(z_author, edge_label_index, params)
    out = jax.block_until_ready(out)

    ref_bf16 = edge_decoder_reference_bf16(z_author, edge_label_index, params)
    ref_f32 = edge_decoder_reference_f32(z_author, edge_label_index, params)

    assert out.shape == (num_edges,)
    assert jnp.allclose(out, ref_bf16, atol=2e-3, rtol=2e-3), (
        float(jnp.max(jnp.abs(out - ref_bf16))))
    assert jnp.allclose(out, ref_f32, atol=1e-1, rtol=1e-1), (
        float(jnp.max(jnp.abs(out - ref_f32))))

    print("KERNEL_OK")
</pallas_src>

<mosaic_0001>
module attributes {stable_mosaic.version = 11 : i64} {
  func.func @_edge_mlp_kernel(%arg0: i32, %arg1: memref<1x128xi32, #tpu.memory_space<vmem>>, %arg2: memref<1x128xi32, #tpu.memory_space<vmem>>, %arg3: memref<32x32xbf16, #tpu.memory_space<vmem>>, %arg4: memref<32x1xf32, #tpu.memory_space<vmem>>, %arg5: memref<32x32xbf16, #tpu.memory_space<vmem>>, %arg6: memref<32x1xf32, #tpu.memory_space<vmem>>, %arg7: memref<32x32xbf16, #tpu.memory_space<vmem>>, %arg8: memref<32x1xf32, #tpu.memory_space<vmem>>, %arg9: memref<32x1xf32, #tpu.memory_space<vmem>>, %arg10: memref<1x1xf32, #tpu.memory_space<vmem>>, %arg11: memref<1x128xf32, #tpu.memory_space<vmem>>) attributes {dimension_semantics = [#tpu.dimension_semantics<parallel>], iteration_bounds = array<i64: 1>, scalar_prefetch = 0 : i64, scratch_operands = 0 : i64, tpu.core_type = #tpu.core_type<tc>, window_params = [{transform_indices = @transform_0, window_bounds = array<i64: 1, 128>}, {transform_indices = @transform_1, window_bounds = array<i64: 1, 128>}, {pipeline_mode = #tpu.pipeline_mode<synchronous>, transform_indices = @transform_2, window_bounds = array<i64: 32, 32>}, {pipeline_mode = #tpu.pipeline_mode<synchronous>, transform_indices = @transform_3, window_bounds = array<i64: 32, 1>}, {pipeline_mode = #tpu.pipeline_mode<synchronous>, transform_indices = @transform_4, window_bounds = array<i64: 32, 32>}, {pipeline_mode = #tpu.pipeline_mode<synchronous>, transform_indices = @transform_5, window_bounds = array<i64: 32, 1>}, {pipeline_mode = #tpu.pipeline_mode<synchronous>, transform_indices = @transform_6, window_bounds = array<i64: 32, 32>}, {pipeline_mode = #tpu.pipeline_mode<synchronous>, transform_indices = @transform_7, window_bounds = array<i64: 32, 1>}, {pipeline_mode = #tpu.pipeline_mode<synchronous>, transform_indices = @transform_8, window_bounds = array<i64: 32, 1>}, {pipeline_mode = #tpu.pipeline_mode<synchronous>, transform_indices = @transform_9, window_bounds = array<i64: 1, 1>}, {transform_indices = @transform_10, window_bounds = array<i64: 1, 128>}]} {
    %0 = tpu.iota {dimensions = array<i32: 0>} : vector<32x128xi32>
    %c0 = arith.constant 0 : index
    %c0_0 = arith.constant 0 : index
    %1 = vector.load %arg1[%c0, %c0_0] : memref<1x128xi32, #tpu.memory_space<vmem>>, vector<1x128xi32>
    %2 = vector.broadcast %1 : vector<1x128xi32> to vector<32x128xi32>
    %3 = arith.cmpi eq, %0, %2 : vector<32x128xi32>
    %c0_1 = arith.constant 0 : index
    %c0_2 = arith.constant 0 : index
    %4 = vector.load %arg2[%c0_1, %c0_2] : memref<1x128xi32, #tpu.memory_space<vmem>>, vector<1x128xi32>
    %c16_i32 = arith.constant 16 : i32
    %5 = vector.broadcast %c16_i32 : i32 to vector<1x128xi32>
    %6 = arith.addi %4, %5 : vector<1x128xi32>
    %7 = vector.broadcast %6 : vector<1x128xi32> to vector<32x128xi32>
    %8 = arith.cmpi eq, %0, %7 : vector<32x128xi32>
    %9 = arith.ori %3, %8 : vector<32x128xi1>
    %10 = arith.extui %9 : vector<32x128xi1> to vector<32x128xi32>
    %11 = arith.sitofp %10 : vector<32x128xi32> to vector<32x128xf32>
    %12 = arith.truncf %11 : vector<32x128xf32> to vector<32x128xbf16>
    %c0_3 = arith.constant 0 : index
    %c0_4 = arith.constant 0 : index
    %13 = vector.load %arg3[%c0_3, %c0_4] : memref<32x32xbf16, #tpu.memory_space<vmem>>, vector<32x32xbf16>
    %cst = arith.constant dense<0.000000e+00> : vector<32x128xf32>
    %14 = tpu.matmul %13, %12, %cst {dimension_numbers = #tpu.dot_dimension_numbers<[1], [0], [0], [1], [0, 0, 1, 1], [], []>} : vector<32x32xbf16>, vector<32x128xbf16>, vector<32x128xf32> -> vector<32x128xf32>
    %c0_5 = arith.constant 0 : index
    %c0_6 = arith.constant 0 : index
    %15 = vector.load %arg4[%c0_5, %c0_6] : memref<32x1xf32, #tpu.memory_space<vmem>>, vector<32x1xf32>
    %16 = vector.broadcast %15 : vector<32x1xf32> to vector<32x128xf32>
    %17 = arith.addf %14, %16 : vector<32x128xf32>
    %cst_7 = arith.constant 0.000000e+00 : f32
    %18 = vector.broadcast %cst_7 : f32 to vector<32x128xf32>
    %19 = arith.maximumf %17, %18 : vector<32x128xf32>
    %c0_8 = arith.constant 0 : index
    %c0_9 = arith.constant 0 : index
    %20 = vector.load %arg5[%c0_8, %c0_9] : memref<32x32xbf16, #tpu.memory_space<vmem>>, vector<32x32xbf16>
    %21 = arith.truncf %19 : vector<32x128xf32> to vector<32x128xbf16>
    %cst_10 = arith.constant dense<0.000000e+00> : vector<32x128xf32>
    %22 = tpu.matmul %20, %21, %cst_10 {dimension_numbers = #tpu.dot_dimension_numbers<[1], [0], [0], [1], [0, 0, 1, 1], [], []>} : vector<32x32xbf16>, vector<32x128xbf16>, vector<32x128xf32> -> vector<32x128xf32>
    %c0_11 = arith.constant 0 : index
    %c0_12 = arith.constant 0 : index
    %23 = vector.load %arg6[%c0_11, %c0_12] : memref<32x1xf32, #tpu.memory_space<vmem>>, vector<32x1xf32>
    %24 = vector.broadcast %23 : vector<32x1xf32> to vector<32x128xf32>
    %25 = arith.addf %22, %24 : vector<32x128xf32>
    %cst_13 = arith.constant 0.000000e+00 : f32
    %26 = vector.broadcast %cst_13 : f32 to vector<32x128xf32>
    %27 = arith.maximumf %25, %26 : vector<32x128xf32>
    %c0_14 = arith.constant 0 : index
    %c0_15 = arith.constant 0 : index
    %28 = vector.load %arg7[%c0_14, %c0_15] : memref<32x32xbf16, #tpu.memory_space<vmem>>, vector<32x32xbf16>
    %29 = arith.truncf %27 : vector<32x128xf32> to vector<32x128xbf16>
    %cst_16 = arith.constant dense<0.000000e+00> : vector<32x128xf32>
    %30 = tpu.matmul %28, %29, %cst_16 {dimension_numbers = #tpu.dot_dimension_numbers<[1], [0], [0], [1], [0, 0, 1, 1], [], []>} : vector<32x32xbf16>, vector<32x128xbf16>, vector<32x128xf32> -> vector<32x128xf32>
    %c0_17 = arith.constant 0 : index
    %c0_18 = arith.constant 0 : index
    %31 = vector.load %arg8[%c0_17, %c0_18] : memref<32x1xf32, #tpu.memory_space<vmem>>, vector<32x1xf32>
    %32 = vector.broadcast %31 : vector<32x1xf32> to vector<32x128xf32>
    %33 = arith.addf %30, %32 : vector<32x128xf32>
    %cst_19 = arith.constant 0.000000e+00 : f32
    %34 = vector.broadcast %cst_19 : f32 to vector<32x128xf32>
    %35 = arith.maximumf %33, %34 : vector<32x128xf32>
    %c0_20 = arith.constant 0 : index
    %c0_21 = arith.constant 0 : index
    %36 = vector.load %arg9[%c0_20, %c0_21] : memref<32x1xf32, #tpu.memory_space<vmem>>, vector<32x1xf32>
    %37 = vector.broadcast %36 : vector<32x1xf32> to vector<32x128xf32>
    %38 = arith.mulf %35, %37 : vector<32x128xf32>
    %cst_22 = arith.constant dense<0.000000e+00> : vector<128xf32>
    %39 = vector.multi_reduction <add>, %38, %cst_22 [0] : vector<32x128xf32> to vector<128xf32>
    %40 = vector.shape_cast %39 : vector<128xf32> to vector<1x128xf32>
    %c0_23 = arith.constant 0 : index
    %c0_24 = arith.constant 0 : index
    %41 = vector.load %arg10[%c0_23, %c0_24] : memref<1x1xf32, #tpu.memory_space<vmem>>, vector<1x1xf32>
    %42 = vector.broadcast %41 : vector<1x1xf32> to vector<1x128xf32>
    %43 = arith.addf %40, %42 : vector<1x128xf32>
    %c0_25 = arith.constant 0 : index
    %c0_26 = arith.constant 0 : index
    %44 = vector.load %arg11[%c0_25, %c0_26] : memref<1x128xf32, #tpu.memory_space<vmem>>, vector<1x128xf32>
    tpu.vector_store %arg11[%c0_25, %c0_26], %43 {strides = array<i32>} : memref<1x128xf32, #tpu.memory_space<vmem>>, vector<1x128xf32>,
    return
  }
  func.func @transform_0(%arg0: i32) -> (i32, i32) {
    %c0_i32 = arith.constant 0 : i32
    %c0_i32_0 = arith.constant 0 : i32
    return %arg0, %c0_i32 : i32, i32
  }
  func.func @transform_1(%arg0: i32) -> (i32, i32) {
    %c0_i32 = arith.constant 0 : i32
    %c0_i32_0 = arith.constant 0 : i32
    return %arg0, %c0_i32 : i32, i32
  }
  func.func @transform_2(%arg0: i32) -> (i32, i32) {
    %c0_i32 = arith.constant 0 : i32
    %c0_i32_0 = arith.constant 0 : i32
    %c0_i32_1 = arith.constant 0 : i32
    return %c0_i32, %c0_i32_0 : i32, i32
  }
  func.func @transform_3(%arg0: i32) -> (i32, i32) {
    %c0_i32 = arith.constant 0 : i32
    %c0_i32_0 = arith.constant 0 : i32
    %c0_i32_1 = arith.constant 0 : i32
    return %c0_i32, %c0_i32_0 : i32, i32
  }
  func.func @transform_4(%arg0: i32) -> (i32, i32) {
    %c0_i32 = arith.constant 0 : i32
    %c0_i32_0 = arith.constant 0 : i32
    %c0_i32_1 = arith.constant 0 : i32
    return %c0_i32, %c0_i32_0 : i32, i32
  }
  func.func @transform_5(%arg0: i32) -> (i32, i32) {
    %c0_i32 = arith.constant 0 : i32
    %c0_i32_0 = arith.constant 0 : i32
    %c0_i32_1 = arith.constant 0 : i32
    return %c0_i32, %c0_i32_0 : i32, i32
  }
  func.func @transform_6(%arg0: i32) -> (i32, i32) {
    %c0_i32 = arith.constant 0 : i32
    %c0_i32_0 = arith.constant 0 : i32
    %c0_i32_1 = arith.constant 0 : i32
    return %c0_i32, %c0_i32_0 : i32, i32
  }
  func.func @transform_7(%arg0: i32) -> (i32, i32) {
    %c0_i32 = arith.constant 0 : i32
    %c0_i32_0 = arith.constant 0 : i32
    %c0_i32_1 = arith.constant 0 : i32
    return %c0_i32, %c0_i32_0 : i32, i32
  }
  func.func @transform_8(%arg0: i32) -> (i32, i32) {
    %c0_i32 = arith.constant 0 : i32
    %c0_i32_0 = arith.constant 0 : i32
    %c0_i32_1 = arith.constant 0 : i32
    return %c0_i32, %c0_i32_0 : i32, i32
  }
  func.func @transform_9(%arg0: i32) -> (i32, i32) {
    %c0_i32 = arith.constant 0 : i32
    %c0_i32_0 = arith.constant 0 : i32
    %c0_i32_1 = arith.constant 0 : i32
    return %c0_i32, %c0_i32_0 : i32, i32
  }
  func.func @transform_10(%arg0: i32) -> (i32, i32) {
    %c0_i32 = arith.constant 0 : i32
    %c0_i32_0 = arith.constant 0 : i32
    return %arg0, %c0_i32 : i32, i32
  }
}

module attributes {stable_mosaic.version = 11 : i64} {
  func.func @_edge_mlp_kernel(%arg0: i32, %arg1: memref<1x128xi32, #tpu.memory_space<vmem>>, %arg2: memref<1x128xi32, #tpu.memory_space<vmem>>, %arg3: memref<32x32xbf16, #tpu.memory_space<vmem>>, %arg4: memref<32x1xf32, #tpu.memory_space<vmem>>, %arg5: memref<32x32xbf16, #tpu.memory_space<vmem>>, %arg6: memref<32x1xf32, #tpu.memory_space<vmem>>, %arg7: memref<32x32xbf16, #tpu.memory_space<vmem>>, %arg8: memref<32x1xf32, #tpu.memory_space<vmem>>, %arg9: memref<32x1xf32, #tpu.memory_space<vmem>>, %arg10: memref<1x1xf32, #tpu.memory_space<vmem>>, %arg11: memref<1x128xf32, #tpu.memory_space<vmem>>) attributes {dimension_semantics = [#tpu.dimension_semantics<parallel>], iteration_bounds = array<i64: 1>, scalar_prefetch = 0 : i64, scratch_operands = 0 : i64, tpu.core_type = #tpu.core_type<tc>, window_params = [{transform_indices = @transform_0, window_bounds = array<i64: 1, 128>}, {transform_indices = @transform_1, window_bounds = array<i64: 1, 128>}, {pipeline_mode = #tpu.pipeline_mode<synchronous>, transform_indices = @transform_2, window_bounds = array<i64: 32, 32>}, {pipeline_mode = #tpu.pipeline_mode<synchronous>, transform_indices = @transform_3, window_bounds = array<i64: 32, 1>}, {pipeline_mode = #tpu.pipeline_mode<synchronous>, transform_indices = @transform_4, window_bounds = array<i64: 32, 32>}, {pipeline_mode = #tpu.pipeline_mode<synchronous>, transform_indices = @transform_5, window_bounds = array<i64: 32, 1>}, {pipeline_mode = #tpu.pipeline_mode<synchronous>, transform_indices = @transform_6, window_bounds = array<i64: 32, 32>}, {pipeline_mode = #tpu.pipeline_mode<synchronous>, transform_indices = @transform_7, window_bounds = array<i64: 32, 1>}, {pipeline_mode = #tpu.pipeline_mode<synchronous>, transform_indices = @transform_8, window_bounds = array<i64: 32, 1>}, {pipeline_mode = #tpu.pipeline_mode<synchronous>, transform_indices = @transform_9, window_bounds = array<i64: 1, 1>}, {transform_indices = @transform_10, window_bounds = array<i64: 1, 128>}]} {
    %0 = tpu.iota {dimensions = array<i32: 0>} : vector<32x128xi32>
    %c0 = arith.constant 0 : index
    %c0_0 = arith.constant 0 : index
    %1 = vector.load %arg1[%c0, %c0_0] : memref<1x128xi32, #tpu.memory_space<vmem>>, vector<1x128xi32>
    %2 = vector.broadcast %1 : vector<1x128xi32> to vector<32x128xi32>
    %3 = arith.cmpi eq, %0, %2 : vector<32x128xi32>
    %c0_1 = arith.constant 0 : index
    %c0_2 = arith.constant 0 : index
    %4 = vector.load %arg2[%c0_1, %c0_2] : memref<1x128xi32, #tpu.memory_space<vmem>>, vector<1x128xi32>
    %c16_i32 = arith.constant 16 : i32
    %5 = vector.broadcast %c16_i32 : i32 to vector<1x128xi32>
    %6 = arith.addi %4, %5 : vector<1x128xi32>
    %7 = vector.broadcast %6 : vector<1x128xi32> to vector<32x128xi32>
    %8 = arith.cmpi eq, %0, %7 : vector<32x128xi32>
    %9 = arith.ori %3, %8 : vector<32x128xi1>
    %10 = arith.extui %9 : vector<32x128xi1> to vector<32x128xi32>
    %11 = arith.sitofp %10 : vector<32x128xi32> to vector<32x128xf32>
    %12 = arith.truncf %11 : vector<32x128xf32> to vector<32x128xbf16>
    %c0_3 = arith.constant 0 : index
    %c0_4 = arith.constant 0 : index
    %13 = vector.load %arg3[%c0_3, %c0_4] : memref<32x32xbf16, #tpu.memory_space<vmem>>, vector<32x32xbf16>
    %cst = arith.constant dense<0.000000e+00> : vector<32x128xf32>
    %14 = tpu.matmul %13, %12, %cst {dimension_numbers = #tpu.dot_dimension_numbers<[1], [0], [0], [1], [0, 0, 1, 1], [], []>} : vector<32x32xbf16>, vector<32x128xbf16>, vector<32x128xf32> -> vector<32x128xf32>
    %c0_5 = arith.constant 0 : index
    %c0_6 = arith.constant 0 : index
    %15 = vector.load %arg4[%c0_5, %c0_6] : memref<32x1xf32, #tpu.memory_space<vmem>>, vector<32x1xf32>
    %16 = vector.broadcast %15 : vector<32x1xf32> to vector<32x128xf32>
    %17 = arith.addf %14, %16 : vector<32x128xf32>
    %cst_7 = arith.constant 0.000000e+00 : f32
    %18 = vector.broadcast %cst_7 : f32 to vector<32x128xf32>
    %19 = arith.maximumf %17, %18 : vector<32x128xf32>
    %c0_8 = arith.constant 0 : index
    %c0_9 = arith.constant 0 : index
    %20 = vector.load %arg5[%c0_8, %c0_9] : memref<32x32xbf16, #tpu.memory_space<vmem>>, vector<32x32xbf16>
    %21 = arith.truncf %19 : vector<32x128xf32> to vector<32x128xbf16>
    %cst_10 = arith.constant dense<0.000000e+00> : vector<32x128xf32>
    %22 = tpu.matmul %20, %21, %cst_10 {dimension_numbers = #tpu.dot_dimension_numbers<[1], [0], [0], [1], [0, 0, 1, 1], [], []>} : vector<32x32xbf16>, vector<32x128xbf16>, vector<32x128xf32> -> vector<32x128xf32>
    %c0_11 = arith.constant 0 : index
    %c0_12 = arith.constant 0 : index
    %23 = vector.load %arg6[%c0_11, %c0_12] : memref<32x1xf32, #tpu.memory_space<vmem>>, vector<32x1xf32>
    %24 = vector.broadcast %23 : vector<32x1xf32> to vector<32x128xf32>
    %25 = arith.addf %22, %24 : vector<32x128xf32>
    %cst_13 = arith.constant 0.000000e+00 : f32
    %26 = vector.broadcast %cst_13 : f32 to vector<32x128xf32>
    %27 = arith.maximumf %25, %26 : vector<32x128xf32>
    %c0_14 = arith.constant 0 : index
    %c0_15 = arith.constant 0 : index
    %28 = vector.load %arg7[%c0_14, %c0_15] : memref<32x32xbf16, #tpu.memory_space<vmem>>, vector<32x32xbf16>
    %29 = arith.truncf %27 : vector<32x128xf32> to vector<32x128xbf16>
    %cst_16 = arith.constant dense<0.000000e+00> : vector<32x128xf32>
    %30 = tpu.matmul %28, %29, %cst_16 {dimension_numbers = #tpu.dot_dimension_numbers<[1], [0], [0], [1], [0, 0, 1, 1], [], []>} : vector<32x32xbf16>, vector<32x128xbf16>, vector<32x128xf32> -> vector<32x128xf32>
    %c0_17 = arith.constant 0 : index
    %c0_18 = arith.constant 0 : index
    %31 = vector.load %arg8[%c0_17, %c0_18] : memref<32x1xf32, #tpu.memory_space<vmem>>, vector<32x1xf32>
    %32 = vector.broadcast %31 : vector<32x1xf32> to vector<32x128xf32>
    %33 = arith.addf %30, %32 : vector<32x128xf32>
    %cst_19 = arith.constant 0.000000e+00 : f32
    %34 = vector.broadcast %cst_19 : f32 to vector<32x128xf32>
    %35 = arith.maximumf %33, %34 : vector<32x128xf32>
    %c0_20 = arith.constant 0 : index
    %c0_21 = arith.constant 0 : index
    %36 = vector.load %arg9[%c0_20, %c0_21] : memref<32x1xf32, #tpu.memory_space<vmem>>, vector<32x1xf32>
    %37 = vector.broadcast %36 : vector<32x1xf32> to vector<32x128xf32>
    %38 = arith.mulf %35, %37 : vector<32x128xf32>
    %cst_22 = arith.constant dense<0.000000e+00> : vector<128xf32>
    %39 = vector.multi_reduction <add>, %38, %cst_22 [0] : vector<32x128xf32> to vector<128xf32>
    %40 = vector.shape_cast %39 : vector<128xf32> to vector<1x128xf32>
    %c0_23 = arith.constant 0 : index
    %c0_24 = arith.constant 0 : index
    %41 = vector.load %arg10[%c0_23, %c0_24] : memref<1x1xf32, #tpu.memory_space<vmem>>, vector<1x1xf32>
    %42 = vector.broadcast %41 : vector<1x1xf32> to vector<1x128xf32>
    %43 = arith.addf %40, %42 : vector<1x128xf32>
    %c0_25 = arith.constant 0 : index
    %c0_26 = arith.constant 0 : index
    %44 = vector.load %arg11[%c0_25, %c0_26] : memref<1x128xf32, #tpu.memory_space<vmem>>, vector<1x128xf32>
    tpu.vector_store %arg11[%c0_25, %c0_26], %43 {strides = array<i32>} : memref<1x128xf32, #tpu.memory_space<vmem>>, vector<1x128xf32>,
    return
  }
  func.func @transform_0(%arg0: i32) -> (i32, i32) {
    %c0_i32 = arith.constant 0 : i32
    %c0_i32_0 = arith.constant 0 : i32
    return %arg0, %c0_i32 : i32, i32
  }
  func.func @transform_1(%arg0: i32) -> (i32, i32) {
    %c0_i32 = arith.constant 0 : i32
    %c0_i32_0 = arith.constant 0 : i32
    return %arg0, %c0_i32 : i32, i32
  }
  func.func @transform_2(%arg0: i32) -> (i32, i32) {
    %c0_i32 = arith.constant 0 : i32
    %c0_i32_0 = arith.constant 0 : i32
    %c0_i32_1 = arith.constant 0 : i32
    return %c0_i32, %c0_i32_0 : i32, i32
  }
  func.func @transform_3(%arg0: i32) -> (i32, i32) {
    %c0_i32 = arith.constant 0 : i32
    %c0_i32_0 = arith.constant 0 : i32
    %c0_i32_1 = arith.constant 0 : i32
    return %c0_i32, %c0_i32_0 : i32, i32
  }
  func.func @transform_4(%arg0: i32) -> (i32, i32) {
    %c0_i32 = arith.constant 0 : i32
    %c0_i32_0 = arith.constant 0 : i32
    %c0_i32_1 = arith.constant 0 : i32
    return %c0_i32, %c0_i32_0 : i32, i32
  }
  func.func @transform_5(%arg0: i32) -> (i32, i32) {
    %c0_i32 = arith.constant 0 : i32
    %c0_i32_0 = arith.constant 0 : i32
    %c0_i32_1 = arith.constant 0 : i32
    return %c0_i32, %c0_i32_0 : i32, i32
  }
  func.func @transform_6(%arg0: i32) -> (i32, i32) {
    %c0_i32 = arith.constant 0 : i32
    %c0_i32_0 = arith.constant 0 : i32
    %c0_i32_1 = arith.constant 0 : i32
    return %c0_i32, %c0_i32_0 : i32, i32
  }
  func.func @transform_7(%arg0: i32) -> (i32, i32) {
    %c0_i32 = arith.constant 0 : i32
    %c0_i32_0 = arith.constant 0 : i32
    %c0_i32_1 = arith.constant 0 : i32
    return %c0_i32, %c0_i32_0 : i32, i32
  }
  func.func @transform_8(%arg0: i32) -> (i32, i32) {
    %c0_i32 = arith.constant 0 : i32
    %c0_i32_0 = arith.constant 0 : i32
    %c0_i32_1 = arith.constant 0 : i32
    return %c0_i32, %c0_i32_0 : i32, i32
  }
  func.func @transform_9(%arg0: i32) -> (i32, i32) {
    %c0_i32 = arith.constant 0 : i32
    %c0_i32_0 = arith.constant 0 : i32
    %c0_i32_1 = arith.constant 0 : i32
    return %c0_i32, %c0_i32_0 : i32, i32
  }
  func.func @transform_10(%arg0: i32) -> (i32, i32) {
    %c0_i32 = arith.constant 0 : i32
    %c0_i32_0 = arith.constant 0 : i32
    return %arg0, %c0_i32 : i32, i32
  }
}

</mosaic_0001>

<bundles_post_ra>
// kernel: tpu_custom_call.1
= control target key start
LH: loop header
LB: loop body
LE: loop exit
PB: predicated region body
PF: predicated region fallthrough
CT: control target
= control target key end

     0   :  { %s691_s0 = inlined_call_operand.vmem [shape: s32[1,128], index: 0, kind: input, shape index: {}]   ;;  %s692_s1 = inlined_call_operand.vmem [shape: s32[1,128], index: 1, kind: input, shape index: {}]   ;;  %s693_s2 = inlined_call_operand.vmem [shape: bf16[32,32], index: 2, kind: input, shape index: {}]   ;;  %s694_s3 = inlined_call_operand.vmem [shape: f32[32,1], index: 3, kind: input, shape index: {}]   ;;  %s695_s4 = inlined_call_operand.vmem [shape: bf16[32,32], index: 4, kind: input, shape index: {}]   ;;  %s696_s5 = inlined_call_operand.vmem [shape: f32[32,1], index: 5, kind: input, shape index: {}]   ;;  %s697_s6 = inlined_call_operand.vmem [shape: bf16[32,32], index: 6, kind: input, shape index: {}]   ;;  %s698_s7 = inlined_call_operand.vmem [shape: f32[32,1], index: 7, kind: input, shape index: {}]   ;;  %s699_s8 = inlined_call_operand.vmem [shape: f32[32,1], index: 8, kind: input, shape index: {}]   ;;  %s700_s9 = inlined_call_operand.<no memory space> [shape: f32[1,1], index: 9, kind: input, shape index: {}]   ;;  %s701_s10 = inlined_call_operand.hbm [shape: f32[1,128], index: 10, kind: output, shape index: {}]  }
   0x1   :  { %v15_v0 = vstv %s700_s9 }
   0x2   :  { %16 = vst [vmem:[#allocation2] sm:$0x1] %v15_v0 }
   0x3   :  { %v39_v1 = vlaneseq  ;;  %v53_v2 = vld [vmem:[%s692_s1] sm:$0x1]  ;;  %vm115_vm0 = vcmask 261120   ;;  %v528_v10 = vmov 0   ;;  %v83_v11 = vld [vmem:[%s694_s3 + $0x10] sm:$0xff]  ;;  %v82_v15 = vld [vmem:[%s694_s3 + $0x8] sm:$0xff] }
   0x4   :  { %v54_v3 = vadd.s32 16, %v53_v2  ;;  %v498_v4 = vld [vmem:[%s693_s2] sm:$0xff]   ;;  %496 = vset.pattern.permute.xlu0 %v528_v10  ;;  %497 = vset.pattern.permute.xlu1 %v528_v10  ;;  %v84_v16 = vld [vmem:[%s694_s3 + $0x18] sm:$0xff]  ;;  %v182_v18 = vld [vmem:[%s696_s5 + $0x8] sm:$0xff]  ;;  %v529_v19 = vmov 1.0|1.0  }
   0x5   :  { %v595_v5 = vshrl.u32 %v39_v1, 7  ;;  %v436_v6 = vld [vmem:[%s691_s0] ss:$0 sm:$0xff]  ;;  %473 = vmatprep.mubr.msk.bf16.mxu0 %vm115_vm0, %v498_v4  ;;  %97 = vperm.xlu1 %497, %v83_v11   ;;  %v183_v20 = vld [vmem:[%s696_s5 + $0x10] sm:$0xff]  ;;  %v184_v21 = vld [vmem:[%s696_s5 + $0x18] sm:$0xff] }
   0x6   :  { %v81_v7 = vld [vmem:[%s694_s3] sm:$0xff] }
   0x7   :  { %v41_v8 = vadd.s32 8, %v595_v5  ;;  %v57_v9 = vsub.s32 0, %v595_v5  ;;  %v42_v12 = vadd.s32 16, %v595_v5  ;;  %87 = vperm.xlu0 %496, %v81_v7   ;;  %vm49_vm1 = vcmp.eq.s32.totalorder %v595_v5, %v436_v6  ;;  %v181_v17 = vld [vmem:[%s696_s5] sm:$0xff] }
   0x8   :  { %v43_v14 = vadd.s32 24, %v595_v5 }
   0x9   :  { %v58_v13 = vrot.slane %v54_v3, %v57_v9  ;;  %vm50_vm2 = vcmp.eq.s32.totalorder %v41_v8, %v436_v6  ;;  %vm51_vm6 = vcmp.eq.s32.totalorder %v42_v12, %v436_v6  ;;  %102 = vperm.xlu1 %497, %v84_v16  }
   0xa   :  { %vm52_vm9 = vcmp.eq.s32.totalorder %v43_v14, %v436_v6 }
   0xb   :  { %vm59_vm3 = vcmp.eq.s32.totalorder %v595_v5, %v58_v13  ;;  %vm60_vm4 = vcmp.eq.s32.totalorder %v41_v8, %v58_v13  ;;  %vm61_vm7 = vcmp.eq.s32.totalorder %v42_v12, %v58_v13  ;;  %92 = vperm.xlu0 %496, %v82_v15   ;;  %vm62_vm10 = vcmp.eq.s32.totalorder %v43_v14, %v58_v13 }
   0xc   :  { %vm63_vm5 = vmor %vm49_vm1, %vm59_vm3 }
   0xd   :  { %vm64_vm8 = vmor %vm50_vm2, %vm60_vm4  ;;  %192 = vperm.xlu1 %497, %v182_v18  }
   0xe   :  { %vm443_vm11 = vmpackc.low %vm64_vm8, %vm63_vm5 }
   0xf   :  { %469 = vmatprep.subr.msk.bf16.mxu0 %vm443_vm11, %v529_v19  ;;  %vm65_vm12 = vmor %vm51_vm6, %vm61_vm7  ;;  %187 = vperm.xlu0 %496, %v181_v17  }
  0x10   :  { %470 = vmatpush3.bf16.msk.msra.mxu0 %vm443_vm11, %v529_v19  ;;  %vm66_vm13 = vmor %vm52_vm9, %vm62_vm10 }
  0x11   :  { %vm445_vm14 = vmpackc.low %vm66_vm13, %vm65_vm12 }
  0x12   :  { %471 = vmatprep.subr.msk.bf16.mxu0 %vm445_vm14, %v529_v19 }
  0x13   :  { %17 = vsyncpa [#allocation4], 0  ;;  %v499_v22 = vld [vmem:[%s693_s2 + $0x8] sm:$0xff]   ;;  %197 = vperm.xlu0 %496, %v183_v20   ;;  %v280_v23 = vld [vmem:[%s698_s7] sm:$0xff]  ;;  %202 = vperm.xlu1 %497, %v184_v21  }
  0x14   :  { %472 = vmatpush3.bf16.msk.msra.mxu0 %vm445_vm14, %v529_v19  ;;  %v281_v24 = vld [vmem:[%s698_s7 + $0x8] sm:$0xff]  ;;  %v282_v25 = vld [vmem:[%s698_s7 + $0x10] sm:$0xff]  ;;  %v283_v26 = vld [vmem:[%s698_s7 + $0x18] sm:$0xff] }
  0x15   :  { %v373_v27 = vld [vmem:[%s699_s8] sm:$0xff]  ;;  %v374_v28 = vld [vmem:[%s699_s8 + $0x8] sm:$0xff]  ;;  %v375_v29 = vld [vmem:[%s699_s8 + $0x10] sm:$0xff] }
  0x16   :  { %v376_v30 = vld [vmem:[%s699_s8 + $0x18] sm:$0xff]  ;;  %v410_v31 = vld [vmem:[#allocation2] sm:$0x1]  ;;  %v501_v51 = vld [vmem:[%s695_s4 + $0x8] sm:$0xff]  }
  0x17   :  { %474 = vmatmul.mubr.msk.bf16.vlgmr.msra.gmra.mrb[0].mxu0 %vm115_vm0, %v499_v22  ;;  %286 = vperm.xlu0 %496, %v280_v23   ;;  %v500_v32 = vld [vmem:[%s695_s4] sm:$0xff]   ;;  %v503_v8 = vld [vmem:[%s697_s6 + $0x8] sm:$0xff]  }
  0x18   :  { %291 = vperm.xlu1 %497, %v281_v24   ;;  %481 = vmatprep.mubr.msk.bf16.mxu1 %vm115_vm0, %v500_v32  ;;  %v502_v52 = vld [vmem:[%s697_s6] sm:$0xff]   ;;  %s530_s6 = smov [#allocation3]  }
  0x19   :  { %489 = vmatprep.mubr.msk.bf16.mxu0 %vm115_vm0, %v502_v52  ;;  %s428_s30 = sshll.u32 %s530_s6, 4  ;;  %s429_s30 = int_to_ptr.vmem [resolvable:$true] %s428_s30 }
  0x1a   :  { %s504_s11 = scalar_lea.vmem %s429_s30, 16  ;;  %s508_s12 = scalar_lea.vmem %s429_s30, 32 }
  0x1b   :  { %296 = vperm.xlu0 %496, %v282_v25   ;;  %p505_p0 = scmp.ne.s32.totalorder %s429_s30, %s504_s11  ;;  %p509_p1 = scmp.lt.s32.totalorder %s429_s30, %s429_s30 }
  0x1c   :  { %301 = vperm.xlu1 %497, %v283_v26   ;;  %p510_p2 = scmp.lt.s32.totalorder %s508_s12, %s504_s11 }
  0x1e   :  { %p511_p3 = por %p510_p2, %p509_p1 }
  0x1f   :  { %379 = vperm.xlu0 %496, %v373_v27  }
  0x20   :  { %384 = vperm.xlu1 %497, %v374_v28   ;;  %p512_p4 = pnand %p511_p3, %p505_p0 }
  0x23   :  { %389 = vperm.xlu0 %496, %v375_v29  }
  0x24   :  { %394 = vperm.xlu1 %497, %v376_v30  }
  0x27   :  { %413 = vperm.xlu0 %496, %v410_v31  }
  0x84   :  { %v98_v33 = vpop.permute.xlu1 %97 }
  0x86   :  { %v88_v34 = vpop.permute.xlu0 %87 }
  0x88   :  { %v103_v38 = vpop.permute.xlu1 %102 }
  0x8a   :  { %v93_v41 = vpop.permute.xlu0 %92 }
  0x8c   :  { %v193_v54 = vpop.permute.xlu1 %192 }
  0x8e   :  { %v188_v53 = vpop.permute.xlu0 %187 }
  0x92   :  { %v198_v55 = vpop.permute.xlu0 %197  ;;  %v203_v59 = vpop.permute.xlu1 %202 }
  0x96   :  { %v287_v10 = vpop.permute.xlu0 %286 }
  0x97   :  { %v292_v11 = vpop.permute.xlu1 %291 }
  0x9a   :  { %v297_v12 = vpop.permute.xlu0 %296 }
  0x9b   :  { %v302_v13 = vpop.permute.xlu1 %301 }
  0x9e   :  { %v380_v19 = vpop.permute.xlu0 %379 }
  0x9f   :  { %v385_v24 = vpop.permute.xlu1 %384 }
  0xa2   :  { %v390_v30 = vpop.permute.xlu0 %389 }
  0xea   :  { %v475_v35 = vpop.f32.mrb[0].mxu0 }
  0xeb   :  { %v165_v36 = vadd.f32 %v475_v35, %v98_v33  ;;  %v156_v37 = vpop.f32.mrb[1].mxu0  ;;  %v395_v33 = vpop.permute.xlu1 %394 }
  0xec   :  { %v157_v39 = vadd.f32 %v156_v37, %v88_v34  ;;  %v476_v40 = vpop.f32.mrb[2].mxu0 }
  0xed   :  { %v168_v42 = vadd.f32 %v476_v40, %v103_v38  ;;  %v159_v43 = vpop.f32.mrb[3].mxu0  ;;  %v173_v45 = vmax.f32 %v165_v36, 0.0 }
  0xee   :  { %v160_v44 = vadd.f32 %v159_v43, %v93_v41  ;;  %v171_v47 = vmax.f32 %v157_v39, 0.0  ;;  %v414_v41 = vpop.permute.xlu0 %413 }
  0xef   :  { %v174_v46 = vmax.f32 %v168_v42, 0.0  ;;  %v419_v43 = vrot.slane %v414_v41, %v57_v9 }
  0xf0   :  { %v172_v48 = vmax.f32 %v160_v44, 0.0 }
  0xf1   :  { %v180_v49 = vpack.c.bf16 %v174_v46, %v173_v45 }
  0xf2   :  { %v179_v50 = vpack.c.bf16 %v172_v48, %v171_v47 }
  0xf4   :  { %477 = vmatprep.subr.bf16.mxu1 %v179_v50 }
  0xf5   :  { %478 = vmatpush3.bf16.msra.mxu1 %v179_v50 }
  0xf6   :  { %479 = vmatprep.subr.bf16.mxu1 %v180_v49 }
  0xf9   :  { %480 = vmatpush3.bf16.msra.mxu1 %v180_v49 }
  0xfc   :  { %482 = vmatmul.mubr.msk.bf16.vlgmr.msra.gmra.mrb[0].mxu1 %vm115_vm0, %v501_v51 }
 0x1cf   :  { %v483_v56 = vpop.f32.mrb[0].mxu1 }
 0x1d0   :  { %v264_v57 = vadd.f32 %v483_v56, %v198_v55  ;;  %v255_v58 = vpop.f32.mrb[1].mxu1 }
 0x1d1   :  { %v256_v60 = vadd.f32 %v255_v58, %v188_v53  ;;  %v484_v61 = vpop.f32.mrb[2].mxu1 }
 0x1d2   :  { %v267_v62 = vadd.f32 %v484_v61, %v203_v59  ;;  %v258_v63 = vpop.f32.mrb[3].mxu1  ;;  %v272_v1 = vmax.f32 %v264_v57, 0.0 }
 0x1d3   :  { %v259_v0 = vadd.f32 %v258_v63, %v193_v54  ;;  %v270_v3 = vmax.f32 %v256_v60, 0.0 }
 0x1d4   :  { %v273_v2 = vmax.f32 %v267_v62, 0.0 }
 0x1d5   :  { %v271_v4 = vmax.f32 %v259_v0, 0.0 }
 0x1d6   :  { %v279_v6 = vpack.c.bf16 %v273_v2, %v272_v1 }
 0x1d7   :  { %v278_v7 = vpack.c.bf16 %v271_v4, %v270_v3 }
 0x1d9   :  { %485 = vmatprep.subr.bf16.mxu0 %v278_v7 }
 0x1da   :  { %486 = vmatpush3.bf16.msra.mxu0 %v278_v7 }
 0x1db   :  { %487 = vmatprep.subr.bf16.mxu0 %v279_v6 }
 0x1de   :  { %488 = vmatpush3.bf16.msra.mxu0 %v279_v6 }
 0x1e1   :  { %490 = vmatmul.mubr.msk.bf16.vlgmr.msra.gmra.mrb[4].mxu0 %vm115_vm0, %v503_v8 }
 0x2b4   :  { %v491_v14 = vpop.f32.mrb[4].mxu0 }
 0x2b5   :  { %v354_v15 = vpop.f32.mrb[5].mxu0  ;;  %v363_v16 = vadd.f32 %v491_v14, %v297_v12 }
 0x2b6   :  { %v355_v17 = vadd.f32 %v354_v15, %v287_v10  ;;  %v492_v18 = vpop.f32.mrb[6].mxu0 }
 0x2b7   :  { %v357_v20 = vpop.f32.mrb[7].mxu0  ;;  %v366_v22 = vadd.f32 %v492_v18, %v302_v13  ;;  %v371_v25 = vmax.f32 %v363_v16, 0.0 }
 0x2b8   :  { %v369_v21 = vmax.f32 %v355_v17, 0.0  ;;  %v358_v23 = vadd.f32 %v357_v20, %v292_v11 }
 0x2b9   :  { %v372_v28 = vmax.f32 %v366_v22, 0.0  ;;  %v399_v31 = vmul.f32 %v390_v30, %v371_v25 }
 0x2ba   :  { %v370_v26 = vmax.f32 %v358_v23, 0.0  ;;  %v397_v27 = vmul.f32 %v380_v19, %v369_v21 }
 0x2bb   :  { %v400_v34 = vmul.f32 %v395_v33, %v372_v28 }
 0x2bc   :  { %v398_v29 = vmul.f32 %v385_v24, %v370_v26 }
 0x2be   :  { %v401_v32 = vadd.f32 %v398_v29, %v397_v27 }
 0x2c0   :  { %v402_v35 = vadd.f32 %v401_v32, %v399_v31 }
 0x2c2   :  { %v403_v36 = vadd.f32 %v402_v35, %v400_v34 }
 0x2c4   :  { %v404_v37 = vrot.slane %v403_v36, 4 }
 0x2c6   :  { %v405_v38 = vadd.f32 %v404_v37, %v403_v36 }
 0x2c8   :  { %v406_v39 = vrot.slane %v405_v38, 2 }
 0x2ca   :  { %v407_v40 = vadd.f32 %v406_v39, %v405_v38 }
 0x2cc   :  { %v408_v42 = vrot.slane %v407_v40, 1 }
 0x2ce   :  { %v409_v44 = vadd.f32 %v408_v42, %v407_v40 }
 0x2d0   :  { %v420_v45 = vadd.f32 %v419_v43, %v409_v44 }
 0x2d2   :  { %421 = vst [vmem:[#allocation3] sm:$0x1] %v420_v45 }
 0x2d3   :  { %515 = shalt.err (!%p512_p4)
}
 0x2d4   :  { %s516_s15 = scalar_lea.hbm %s701_s10, 16 }
 0x2d5   :  { %p517_p5 = scmp.ne.s32.totalorder %s701_s10, %s516_s15  ;;  %p520_p6 = scmp.lt.u32.totalorder %s516_s15, %s701_s10 }
 0x2d7   :  { %p522_p7 = pnand %p520_p6, %p517_p5 }
 0x2d9   :  { %525 = shalt.err (!%p522_p7)
}
 0x2da   :  { %431 = dma.vmem_to_hbm [thread:$0]  %s429_s30, 16, %s701_s10, [#allocation4]  }
 0x2db   :  { %526 = dma.done.wait [#allocation4], 16  }
 0x2dc   :  { %527 = vsyncadd [#allocation4], 4294967280 }
 0x2dd   :  { %435 = vsyncpa [#allocation4], 1 }

// kernel: tpu_custom_call.1
= control target key start
LH: loop header
LB: loop body
LE: loop exit
PB: predicated region body
PF: predicated region fallthrough
CT: control target
= control target key end

     0   :  { %s691_s0 = inlined_call_operand.vmem [shape: s32[1,128], index: 0, kind: input, shape index: {}]   ;;  %s692_s1 = inlined_call_operand.vmem [shape: s32[1,128], index: 1, kind: input, shape index: {}]   ;;  %s693_s2 = inlined_call_operand.vmem [shape: bf16[32,32], index: 2, kind: input, shape index: {}]   ;;  %s694_s3 = inlined_call_operand.vmem [shape: f32[32,1], index: 3, kind: input, shape index: {}]   ;;  %s695_s4 = inlined_call_operand.vmem [shape: bf16[32,32], index: 4, kind: input, shape index: {}]   ;;  %s696_s5 = inlined_call_operand.vmem [shape: f32[32,1], index: 5, kind: input, shape index: {}]   ;;  %s697_s6 = inlined_call_operand.vmem [shape: bf16[32,32], index: 6, kind: input, shape index: {}]   ;;  %s698_s7 = inlined_call_operand.vmem [shape: f32[32,1], index: 7, kind: input, shape index: {}]   ;;  %s699_s8 = inlined_call_operand.vmem [shape: f32[32,1], index: 8, kind: input, shape index: {}]   ;;  %s700_s9 = inlined_call_operand.<no memory space> [shape: f32[1,1], index: 9, kind: input, shape index: {}]   ;;  %s701_s10 = inlined_call_operand.hbm [shape: f32[1,128], index: 10, kind: output, shape index: {}]  }
   0x1   :  { %v15_v0 = vstv %s700_s9 }
   0x2   :  { %16 = vst [vmem:[#allocation2] sm:$0x1] %v15_v0 }
   0x3   :  { %v39_v1 = vlaneseq  ;;  %v53_v2 = vld [vmem:[%s692_s1] sm:$0x1]  ;;  %vm115_vm0 = vcmask 261120   ;;  %v528_v10 = vmov 0   ;;  %v83_v11 = vld [vmem:[%s694_s3 + $0x10] sm:$0xff]  ;;  %v82_v15 = vld [vmem:[%s694_s3 + $0x8] sm:$0xff] }
   0x4   :  { %v54_v3 = vadd.s32 16, %v53_v2  ;;  %v498_v4 = vld [vmem:[%s693_s2] sm:$0xff]   ;;  %496 = vset.pattern.permute.xlu0 %v528_v10  ;;  %497 = vset.pattern.permute.xlu1 %v528_v10  ;;  %v84_v16 = vld [vmem:[%s694_s3 + $0x18] sm:$0xff]  ;;  %v182_v18 = vld [vmem:[%s696_s5 + $0x8] sm:$0xff]  ;;  %v529_v19 = vmov 1.0|1.0  }
   0x5   :  { %v595_v5 = vshrl.u32 %v39_v1, 7  ;;  %v436_v6 = vld [vmem:[%s691_s0] ss:$0 sm:$0xff]  ;;  %473 = vmatprep.mubr.msk.bf16.mxu0 %vm115_vm0, %v498_v4  ;;  %97 = vperm.xlu1 %497, %v83_v11   ;;  %v183_v20 = vld [vmem:[%s696_s5 + $0x10] sm:$0xff]  ;;  %v184_v21 = vld [vmem:[%s696_s5 + $0x18] sm:$0xff] }
   0x6   :  { %v81_v7 = vld [vmem:[%s694_s3] sm:$0xff] }
   0x7   :  { %v41_v8 = vadd.s32 8, %v595_v5  ;;  %v57_v9 = vsub.s32 0, %v595_v5  ;;  %v42_v12 = vadd.s32 16, %v595_v5  ;;  %87 = vperm.xlu0 %496, %v81_v7   ;;  %vm49_vm1 = vcmp.eq.s32.totalorder %v595_v5, %v436_v6  ;;  %v181_v17 = vld [vmem:[%s696_s5] sm:$0xff] }
   0x8   :  { %v43_v14 = vadd.s32 24, %v595_v5 }
   0x9   :  { %v58_v13 = vrot.slane %v54_v3, %v57_v9  ;;  %vm50_vm2 = vcmp.eq.s32.totalorder %v41_v8, %v436_v6  ;;  %vm51_vm6 = vcmp.eq.s32.totalorder %v42_v12, %v436_v6  ;;  %102 = vperm.xlu1 %497, %v84_v16  }
   0xa   :  { %vm52_vm9 = vcmp.eq.s32.totalorder %v43_v14, %v436_v6 }
   0xb   :  { %vm59_vm3 = vcmp.eq.s32.totalorder %v595_v5, %v58_v13  ;;  %vm60_vm4 = vcmp.eq.s32.totalorder %v41_v8, %v58_v13  ;;  %vm61_vm7 = vcmp.eq.s32.totalorder %v42_v12, %v58_v13  ;;  %92 = vperm.xlu0 %496, %v82_v15   ;;  %vm62_vm10 = vcmp.eq.s32.totalorder %v43_v14, %v58_v13 }
   0xc   :  { %vm63_vm5 = vmor %vm49_vm1, %vm59_vm3 }
   0xd   :  { %vm64_vm8 = vmor %vm50_vm2, %vm60_vm4  ;;  %192 = vperm.xlu1 %497, %v182_v18  }
   0xe   :  { %vm443_vm11 = vmpackc.low %vm64_vm8, %vm63_vm5 }
   0xf   :  { %469 = vmatprep.subr.msk.bf16.mxu0 %vm443_vm11, %v529_v19  ;;  %vm65_vm12 = vmor %vm51_vm6, %vm61_vm7  ;;  %187 = vperm.xlu0 %496, %v181_v17  }
  0x10   :  { %470 = vmatpush3.bf16.msk.msra.mxu0 %vm443_vm11, %v529_v19  ;;  %vm66_vm13 = vmor %vm52_vm9, %vm62_vm10 }
  0x11   :  { %vm445_vm14 = vmpackc.low %vm66_vm13, %vm65_vm12 }
  0x12   :  { %471 = vmatprep.subr.msk.bf16.mxu0 %vm445_vm14, %v529_v19 }
  0x13   :  { %17 = vsyncpa [#allocation4], 0  ;;  %v499_v22 = vld [vmem:[%s693_s2 + $0x8] sm:$0xff]   ;;  %197 = vperm.xlu0 %496, %v183_v20   ;;  %v280_v23 = vld [vmem:[%s698_s7] sm:$0xff]  ;;  %202 = vperm.xlu1 %497, %v184_v21  }
  0x14   :  { %472 = vmatpush3.bf16.msk.msra.mxu0 %vm445_vm14, %v529_v19  ;;  %v281_v24 = vld [vmem:[%s698_s7 + $0x8] sm:$0xff]  ;;  %v282_v25 = vld [vmem:[%s698_s7 + $0x10] sm:$0xff]  ;;  %v283_v26 = vld [vmem:[%s698_s7 + $0x18] sm:$0xff] }
  0x15   :  { %v373_v27 = vld [vmem:[%s699_s8] sm:$0xff]  ;;  %v374_v28 = vld [vmem:[%s699_s8 + $0x8] sm:$0xff]  ;;  %v375_v29 = vld [vmem:[%s699_s8 + $0x10] sm:$0xff] }
  0x16   :  { %v376_v30 = vld [vmem:[%s699_s8 + $0x18] sm:$0xff]  ;;  %v410_v31 = vld [vmem:[#allocation2] sm:$0x1]  ;;  %v501_v51 = vld [vmem:[%s695_s4 + $0x8] sm:$0xff]  }
  0x17   :  { %474 = vmatmul.mubr.msk.bf16.vlgmr.msra.gmra.mrb[0].mxu0 %vm115_vm0, %v499_v22  ;;  %286 = vperm.xlu0 %496, %v280_v23   ;;  %v500_v32 = vld [vmem:[%s695_s4] sm:$0xff]   ;;  %v503_v8 = vld [vmem:[%s697_s6 + $0x8] sm:$0xff]  }
  0x18   :  { %291 = vperm.xlu1 %497, %v281_v24   ;;  %481 = vmatprep.mubr.msk.bf16.mxu1 %vm115_vm0, %v500_v32  ;;  %v502_v52 = vld [vmem:[%s697_s6] sm:$0xff]   ;;  %s530_s6 = smov [#allocation3]  }
  0x19   :  { %489 = vmatprep.mubr.msk.bf16.mxu0 %vm115_vm0, %v502_v52  ;;  %s428_s30 = sshll.u32 %s530_s6, 4  ;;  %s429_s30 = int_to_ptr.vmem [resolvable:$true] %s428_s30 }
  0x1a   :  { %s504_s11 = scalar_lea.vmem %s429_s30, 16  ;;  %s508_s12 = scalar_lea.vmem %s429_s30, 32 }
  0x1b   :  { %296 = vperm.xlu0 %496, %v282_v25   ;;  %p505_p0 = scmp.ne.s32.totalorder %s429_s30, %s504_s11  ;;  %p509_p1 = scmp.lt.s32.totalorder %s429_s30, %s429_s30 }
  0x1c   :  { %301 = vperm.xlu1 %497, %v283_v26   ;;  %p510_p2 = scmp.lt.s32.totalorder %s508_s12, %s504_s11 }
  0x1e   :  { %p511_p3 = por %p510_p2, %p509_p1 }
  0x1f   :  { %379 = vperm.xlu0 %496, %v373_v27  }
  0x20   :  { %384 = vperm.xlu1 %497, %v374_v28   ;;  %p512_p4 = pnand %p511_p3, %p505_p0 }
  0x23   :  { %389 = vperm.xlu0 %496, %v375_v29  }
  0x24   :  { %394 = vperm.xlu1 %497, %v376_v30  }
  0x27   :  { %413 = vperm.xlu0 %496, %v410_v31  }
  0x84   :  { %v98_v33 = vpop.permute.xlu1 %97 }
  0x86   :  { %v88_v34 = vpop.permute.xlu0 %87 }
  0x88   :  { %v103_v38 = vpop.permute.xlu1 %102 }
  0x8a   :  { %v93_v41 = vpop.permute.xlu0 %92 }
  0x8c   :  { %v193_v54 = vpop.permute.xlu1 %192 }
  0x8e   :  { %v188_v53 = vpop.permute.xlu0 %187 }
  0x92   :  { %v198_v55 = vpop.permute.xlu0 %197  ;;  %v203_v59 = vpop.permute.xlu1 %202 }
  0x96   :  { %v287_v10 = vpop.permute.xlu0 %286 }
  0x97   :  { %v292_v11 = vpop.permute.xlu1 %291 }
  0x9a   :  { %v297_v12 = vpop.permute.xlu0 %296 }
  0x9b   :  { %v302_v13 = vpop.permute.xlu1 %301 }
  0x9e   :  { %v380_v19 = vpop.permute.xlu0 %379 }
  0x9f   :  { %v385_v24 = vpop.permute.xlu1 %384 }
  0xa2   :  { %v390_v30 = vpop.permute.xlu0 %389 }
  0xea   :  { %v475_v35 = vpop.f32.mrb[0].mxu0 }
  0xeb   :  { %v165_v36 = vadd.f32 %v475_v35, %v98_v33  ;;  %v156_v37 = vpop.f32.mrb[1].mxu0  ;;  %v395_v33 = vpop.permute.xlu1 %394 }
  0xec   :  { %v157_v39 = vadd.f32 %v156_v37, %v88_v34  ;;  %v476_v40 = vpop.f32.mrb[2].mxu0 }
  0xed   :  { %v168_v42 = vadd.f32 %v476_v40, %v103_v38  ;;  %v159_v43 = vpop.f32.mrb[3].mxu0  ;;  %v173_v45 = vmax.f32 %v165_v36, 0.0 }
  0xee   :  { %v160_v44 = vadd.f32 %v159_v43, %v93_v41  ;;  %v171_v47 = vmax.f32 %v157_v39, 0.0  ;;  %v414_v41 = vpop.permute.xlu0 %413 }
  0xef   :  { %v174_v46 = vmax.f32 %v168_v42, 0.0  ;;  %v419_v43 = vrot.slane %v414_v41, %v57_v9 }
  0xf0   :  { %v172_v48 = vmax.f32 %v160_v44, 0.0 }
  0xf1   :  { %v180_v49 = vpack.c.bf16 %v174_v46, %v173_v45 }
  0xf2   :  { %v179_v50 = vpack.c.bf16 %v172_v48, %v171_v47 }
  0xf4   :  { %477 = vmatprep.subr.bf16.mxu1 %v179_v50 }
  0xf5   :  { %478 = vmatpush3.bf16.msra.mxu1 %v179_v50 }
  0xf6   :  { %479 = vmatprep.subr.bf16.mxu1 %v180_v49 }
  0xf9   :  { %480 = vmatpush3.bf16.msra.mxu1 %v180_v49 }
  0xfc   :  { %482 = vmatmul.mubr.msk.bf16.vlgmr.msra.gmra.mrb[0].mxu1 %vm115_vm0, %v501_v51 }
 0x1cf   :  { %v483_v56 = vpop.f32.mrb[0].mxu1 }
 0x1d0   :  { %v264_v57 = vadd.f32 %v483_v56, %v198_v55  ;;  %v255_v58 = vpop.f32.mrb[1].mxu1 }
 0x1d1   :  { %v256_v60 = vadd.f32 %v255_v58, %v188_v53  ;;  %v484_v61 = vpop.f32.mrb[2].mxu1 }
 0x1d2   :  { %v267_v62 = vadd.f32 %v484_v61, %v203_v59  ;;  %v258_v63 = vpop.f32.mrb[3].mxu1  ;;  %v272_v1 = vmax.f32 %v264_v57, 0.0 }
 0x1d3   :  { %v259_v0 = vadd.f32 %v258_v63, %v193_v54  ;;  %v270_v3 = vmax.f32 %v256_v60, 0.0 }
 0x1d4   :  { %v273_v2 = vmax.f32 %v267_v62, 0.0 }
 0x1d5   :  { %v271_v4 = vmax.f32 %v259_v0, 0.0 }
 0x1d6   :  { %v279_v6 = vpack.c.bf16 %v273_v2, %v272_v1 }
 0x1d7   :  { %v278_v7 = vpack.c.bf16 %v271_v4, %v270_v3 }
 0x1d9   :  { %485 = vmatprep.subr.bf16.mxu0 %v278_v7 }
 0x1da   :  { %486 = vmatpush3.bf16.msra.mxu0 %v278_v7 }
 0x1db   :  { %487 = vmatprep.subr.bf16.mxu0 %v279_v6 }
 0x1de   :  { %488 = vmatpush3.bf16.msra.mxu0 %v279_v6 }
 0x1e1   :  { %490 = vmatmul.mubr.msk.bf16.vlgmr.msra.gmra.mrb[4].mxu0 %vm115_vm0, %v503_v8 }
 0x2b4   :  { %v491_v14 = vpop.f32.mrb[4].mxu0 }
 0x2b5   :  { %v354_v15 = vpop.f32.mrb[5].mxu0  ;;  %v363_v16 = vadd.f32 %v491_v14, %v297_v12 }
 0x2b6   :  { %v355_v17 = vadd.f32 %v354_v15, %v287_v10  ;;  %v492_v18 = vpop.f32.mrb[6].mxu0 }
 0x2b7   :  { %v357_v20 = vpop.f32.mrb[7].mxu0  ;;  %v366_v22 = vadd.f32 %v492_v18, %v302_v13  ;;  %v371_v25 = vmax.f32 %v363_v16, 0.0 }
 0x2b8   :  { %v369_v21 = vmax.f32 %v355_v17, 0.0  ;;  %v358_v23 = vadd.f32 %v357_v20, %v292_v11 }
 0x2b9   :  { %v372_v28 = vmax.f32 %v366_v22, 0.0  ;;  %v399_v31 = vmul.f32 %v390_v30, %v371_v25 }
 0x2ba   :  { %v370_v26 = vmax.f32 %v358_v23, 0.0  ;;  %v397_v27 = vmul.f32 %v380_v19, %v369_v21 }
 0x2bb   :  { %v400_v34 = vmul.f32 %v395_v33, %v372_v28 }
 0x2bc   :  { %v398_v29 = vmul.f32 %v385_v24, %v370_v26 }
 0x2be   :  { %v401_v32 = vadd.f32 %v398_v29, %v397_v27 }
 0x2c0   :  { %v402_v35 = vadd.f32 %v401_v32, %v399_v31 }
 0x2c2   :  { %v403_v36 = vadd.f32 %v402_v35, %v400_v34 }
 0x2c4   :  { %v404_v37 = vrot.slane %v403_v36, 4 }
 0x2c6   :  { %v405_v38 = vadd.f32 %v404_v37, %v403_v36 }
 0x2c8   :  { %v406_v39 = vrot.slane %v405_v38, 2 }
 0x2ca   :  { %v407_v40 = vadd.f32 %v406_v39, %v405_v38 }
 0x2cc   :  { %v408_v42 = vrot.slane %v407_v40, 1 }
 0x2ce   :  { %v409_v44 = vadd.f32 %v408_v42, %v407_v40 }
 0x2d0   :  { %v420_v45 = vadd.f32 %v419_v43, %v409_v44 }
 0x2d2   :  { %421 = vst [vmem:[#allocation3] sm:$0x1] %v420_v45 }
 0x2d3   :  { %515 = shalt.err (!%p512_p4)
}
 0x2d4   :  { %s516_s15 = scalar_lea.hbm %s701_s10, 16 }
 0x2d5   :  { %p517_p5 = scmp.ne.s32.totalorder %s701_s10, %s516_s15  ;;  %p520_p6 = scmp.lt.u32.totalorder %s516_s15, %s701_s10 }
 0x2d7   :  { %p522_p7 = pnand %p520_p6, %p517_p5 }
 0x2d9   :  { %525 = shalt.err (!%p522_p7)
}
 0x2da   :  { %431 = dma.vmem_to_hbm [thread:$0]  %s429_s30, 16, %s701_s10, [#allocation4]  }
 0x2db   :  { %526 = dma.done.wait [#allocation4], 16  }
 0x2dc   :  { %527 = vsyncadd [#allocation4], 4294967280 }
 0x2dd   :  { %435 = vsyncpa [#allocation4], 1 }

</bundles_post_ra>
